<compile_context>
chip_gen: v7x
topology: tpu7x:2x2x1
jax: 0.10.0
libtpu: 0.0.40
codegen_flags: <defaults>
</compile_context>

<pallas_src>
import functools

import jax
import jax.numpy as jnp
from jax.experimental import pallas as pl
from jax.experimental.pallas import tpu as pltpu


_BLOCK_BUDGET_BYTES = 8 * 1024 * 1024    # target bytes per (single) input block
_ACC_MAX_LANES = 512                     # max lane width of the running sum/max scratch


# ----------------------------------------------------------------------------
# Kernel A: small spatial extent -> pool a whole batch-block of images per step.
# ----------------------------------------------------------------------------
def _ca_batched_kernel(x_ref, w1_ref, w2_ref, o_ref, *, inv_S):
    # x_ref : (bn, C, S)   bn images; channels on sublanes, spatial on lanes
    # w1_ref: (Cm, C)      f1 weight (1x1 conv, squeeze)
    # w2_ref: (C, Cm)      f2 weight (1x1 conv, excite)
    # o_ref : (1, bn, C)   lane-dense per-image channel attention
    x = x_ref[...]
    avg = jnp.sum(x.astype(jnp.float32), axis=2) * inv_S          # (bn, C)
    mxv = jnp.max(x, axis=2).astype(jnp.float32)                  # (bn, C)

    w1 = w1_ref[...].astype(jnp.float32)                          # (Cm, C)
    w2 = w2_ref[...].astype(jnp.float32)                          # (C, Cm)
    dn = (((1,), (1,)), ((), ()))                                  # A @ B.T pattern
    # f2(relu(f1(avg))) + f2(relu(f1(max))) == f2(relu(f1(avg)) + relu(f1(max)))  (f2 linear)
    h = (jnp.maximum(jax.lax.dot_general(avg, w1, dn,
                                         preferred_element_type=jnp.float32), 0.0)
         + jnp.maximum(jax.lax.dot_general(mxv, w1, dn,
                                           preferred_element_type=jnp.float32), 0.0))  # (bn, Cm)
    logits = jax.lax.dot_general(h, w2, dn,
                                 preferred_element_type=jnp.float32)                   # (bn, C)
    y = 1.0 / (1.0 + jnp.exp(-logits))
    o_ref[...] = y[None].astype(o_ref.dtype)


# ----------------------------------------------------------------------------
# Kernel B: large spatial extent -> stream one image in lane-dense (C, ts) tiles.
# ----------------------------------------------------------------------------
def _ca_streaming_kernel(x_ref, w1_ref, w2_ref, o_ref, psum_ref, pmax_ref,
                         *, S, ts, acc_w, inv_S):
    # x_ref   : (1, C, ts)       one spatial tile of one image
    # o_ref   : (1, C, 1)        per-image channel attention
    # psum_ref/pmax_ref : (C, acc_w) f32 running elementwise sum / max
    s = pl.program_id(1)
    n_s = pl.num_programs(1)
    nfold = ts // acc_w

    @pl.when(s == 0)
    def _init():
        psum_ref[...] = jnp.zeros_like(psum_ref)
        pmax_ref[...] = jnp.full_like(pmax_ref, -jnp.inf)

    def _accumulate(mask_tail):
        # Fold the (C, ts) tile into the narrow (C, acc_w) accumulators with static,
        # 128-aligned lane slices: pure VPU add/max, hidden under the HBM DMA.
        for j in range(nfold):
            xj = x_ref[0, :, j * acc_w:(j + 1) * acc_w].astype(jnp.float32)   # (C, acc_w)
            if mask_tail:
                col = (jax.lax.broadcasted_iota(jnp.int32, xj.shape, 1)
                       + (s * ts + j * acc_w))
                valid = col < S
                x_sum = jnp.where(valid, xj, 0.0)
                x_max = jnp.where(valid, xj, -jnp.inf)
            else:
                x_sum = xj
                x_max = xj
            psum_ref[...] = psum_ref[...] + x_sum
            pmax_ref[...] = jnp.maximum(pmax_ref[...], x_max)

    if S % ts != 0:
        # Only the single partial tail tile pays the iota/compare/select mask.
        @pl.when(s < n_s - 1)
        def _steady():
            _accumulate(False)

        @pl.when(s == n_s - 1)
        def _tail():
            _accumulate(True)
    else:
        _accumulate(False)

    @pl.when(s == n_s - 1)
    def _finalize():
        # Single cross-lane reduction per image.
        avg = jnp.sum(psum_ref[...], axis=1, keepdims=True) * inv_S   # (C, 1)
        mxv = jnp.max(pmax_ref[...], axis=1, keepdims=True)           # (C, 1)
        w1 = w1_ref[...].astype(jnp.float32)                          # (Cm, C)
        w2 = w2_ref[...].astype(jnp.float32)                          # (C, Cm)
        h = (jnp.maximum(jnp.dot(w1, avg, preferred_element_type=jnp.float32), 0.0)
             + jnp.maximum(jnp.dot(w1, mxv, preferred_element_type=jnp.float32), 0.0))  # (Cm, 1)
        logits = jnp.dot(w2, h, preferred_element_type=jnp.float32)                     # (C, 1)
        y = 1.0 / (1.0 + jnp.exp(-logits))
        # One (C, 1) store per >=several-MiB streamed image: negligible; keeps the
        # proven column-oriented MLP (no extra relayout in the epilogue).
        o_ref[...] = y[None].astype(o_ref.dtype)


def _largest_divisor_at_most(n, cap):
    cap = max(1, min(n, cap))
    for d in range(cap, 0, -1):
        if n % d == 0:
            return d
    return 1


def channel_attention_forward(x_nchw, w1, w2, *, block_budget_bytes=_BLOCK_BUDGET_BYTES):
    """x: (N, C, H, W), w1: (C//ratio, C), w2: (C, C//ratio) -> (N, C, 1, 1)."""
    N, C, H, W = x_nchw.shape
    Cm = w1.shape[0]
    assert w1.shape == (Cm, C) and w2.shape == (C, Cm)
    S = H * W
    x3 = x_nchw.reshape(N, C, S)               # contiguous reshape: no HBM copy
    itemsize = x3.dtype.itemsize
    per_image_bytes = C * S * itemsize

    cost = pl.CostEstimate(
        flops=2 * N * C * S + 6 * N * C * Cm,                     # streamed add+max, tiny MLP
        transcendentals=N * C,                                    # sigmoid exp
        bytes_accessed=N * C * S * itemsize
        + 2 * C * Cm * w1.dtype.itemsize + N * C * itemsize,
    )

    min_tile_bytes = C * 128 * itemsize
    if per_image_bytes <= block_budget_bytes or min_tile_bytes > block_budget_bytes:
        # ---- small-spatial path (or extreme-C fallback): batch images per grid step.
        bn = _largest_divisor_at_most(N, max(1, block_budget_bytes // per_image_bytes))
        nb = N // bn
        in_block_bytes = bn * per_image_bytes
        need = (2 * in_block_bytes                              # double-buffered input
                + (bn * C * S * 4 if itemsize != 4 else 0)      # possible f32 upcast temp
                + (4 << 20))                                    # weights/out/margin
        vmem_limit = int(min(48 << 20, max(32 << 20, need)))

        out = pl.pallas_call(
            functools.partial(_ca_batched_kernel, inv_S=1.0 / S),
            out_shape=jax.ShapeDtypeStruct((nb, bn, C), x_nchw.dtype),
            grid=(nb,),
            in_specs=[
                pl.BlockSpec((bn, C, S), lambda b: (b, 0, 0)),
                pl.BlockSpec((Cm, C), lambda b: (0, 0)),
                pl.BlockSpec((C, Cm), lambda b: (0, 0)),
            ],
            out_specs=pl.BlockSpec((1, bn, C), lambda b: (b, 0, 0)),
            compiler_params=pltpu.CompilerParams(
                dimension_semantics=("parallel",),
                vmem_limit_bytes=vmem_limit),
            cost_estimate=cost,
        )(x3, w1, w2)
        return out.reshape(N, C, 1, 1)

    # ---- large-spatial streaming path: one image per batch step, lane tiles of S.
    acc_w = _ACC_MAX_LANES
    while acc_w > 128 and 2 * C * acc_w * 4 > (1 << 20):   # keep f32 scratch <= ~1 MiB
        acc_w //= 2
    max_ts = block_budget_bytes // (C * itemsize)          # < S here by construction
    ts = max(acc_w, (max_ts // acc_w) * acc_w)             # 128-aligned, big as budget allows
    n_s = pl.cdiv(S, ts)
    need = 2 * (C * ts * itemsize) + 2 * (C * acc_w * 4) + (4 << 20)
    vmem_limit = int(min(48 << 20, max(32 << 20, need)))

    out = pl.pallas_call(
        functools.partial(_ca_streaming_kernel, S=S, ts=ts, acc_w=acc_w, inv_S=1.0 / S),
        out_shape=jax.ShapeDtypeStruct((N, C, 1), x_nchw.dtype),
        grid=(N, n_s),
        in_specs=[
            pl.BlockSpec((1, C, ts), lambda n, s: (n, 0, s)),
            pl.BlockSpec((Cm, C), lambda n, s: (0, 0)),
            pl.BlockSpec((C, Cm), lambda n, s: (0, 0)),
        ],
        out_specs=pl.BlockSpec((1, C, 1), lambda n, s: (n, 0, 0)),
        scratch_shapes=[
            pltpu.VMEM((C, acc_w), jnp.float32),    # running sum
            pltpu.VMEM((C, acc_w), jnp.float32),    # running max
        ],
        compiler_params=pltpu.CompilerParams(
            dimension_semantics=("parallel", "arbitrary"),
            vmem_limit_bytes=vmem_limit),
        cost_estimate=cost,
    )(x3, w1, w2)
    return out.reshape(N, C, 1, 1)


# ----------------------------------------------------------------------------
# Pure-JAX reference (mirrors the PyTorch ChannelAttention.forward)
# ----------------------------------------------------------------------------
def channel_attention_reference(x, w1, w2):
    avg = jnp.mean(x, axis=(2, 3))                 # AdaptiveAvgPool2d(1)
    mx = jnp.max(x, axis=(2, 3))                   # AdaptiveMaxPool2d(1)

    def mlp(v):                                    # f2(relu(f1(v))), bias-free 1x1 convs
        h = jnp.maximum(jnp.dot(v, w1.T), 0.0)
        return jnp.dot(h, w2.T)

    logits = mlp(avg) + mlp(mx)
    out = jax.nn.sigmoid(logits)
    N, C = out.shape
    return out.reshape(N, C, 1, 1)


if __name__ == "__main__":
    key = jax.random.PRNGKey(0)
    k_x, k_w1, k_w2, k_x2 = jax.random.split(key, 4)

    # Shapes consistent with ChannelAttention(in_planes=64, ratio=16) -> hidden = 4.
    N, C, ratio = 2, 64, 16
    Cm = C // ratio

    w1 = jax.random.normal(k_w1, (Cm, C), dtype=jnp.float32) * (1.0 / (C ** 0.5))
    w2 = jax.random.normal(k_w2, (C, Cm), dtype=jnp.float32) * (1.0 / (Cm ** 0.5))

    # 1) Small-spatial path (images batched per grid step, lane-dense output).
    x = jax.random.normal(k_x, (N, C, 16, 16), dtype=jnp.float32)
    out = jax.block_until_ready(channel_attention_forward(x, w1, w2))
    ref = jax.block_until_ready(channel_attention_reference(x, w1, w2))
    assert out.shape == (N, C, 1, 1), out.shape
    assert jnp.allclose(out, ref, rtol=1e-5, atol=1e-5), float(
        jnp.max(jnp.abs(out - ref)))

    # 2) Streaming path (lane tiling + tail-only mask), forced via a small block budget.
    x2 = jax.random.normal(k_x2, (N, C, 34, 34), dtype=jnp.float32)
    out2 = jax.block_until_ready(
        channel_attention_forward(x2, w1, w2, block_budget_bytes=64 * 1024))
    ref2 = jax.block_until_ready(channel_attention_reference(x2, w1, w2))
    assert out2.shape == (N, C, 1, 1), out2.shape
    assert jnp.allclose(out2, ref2, rtol=1e-5, atol=1e-5), float(
        jnp.max(jnp.abs(out2 - ref2)))

    print("KERNEL_OK")
</pallas_src>

<mosaic_0001>
module attributes {stable_mosaic.version = 11 : i64} {
  func.func @_ca_batched_kernel(%arg0: i32, %arg1: memref<2x64x256xf32, #tpu.memory_space<vmem>>, %arg2: memref<4x64xf32, #tpu.memory_space<vmem>>, %arg3: memref<64x4xf32, #tpu.memory_space<vmem>>, %arg4: memref<1x2x64xf32, #tpu.memory_space<vmem>>) attributes {dimension_semantics = [#tpu.dimension_semantics<parallel>], iteration_bounds = array<i64: 1>, scalar_prefetch = 0 : i64, scratch_operands = 0 : i64, tpu.core_type = #tpu.core_type<tc>, window_params = [{transform_indices = @transform_0, window_bounds = array<i64: 2, 64, 256>}, {pipeline_mode = #tpu.pipeline_mode<synchronous>, transform_indices = @transform_1, window_bounds = array<i64: 4, 64>}, {pipeline_mode = #tpu.pipeline_mode<synchronous>, transform_indices = @transform_2, window_bounds = array<i64: 64, 4>}, {transform_indices = @transform_3, window_bounds = array<i64: 1, 2, 64>}]} {
    %c0 = arith.constant 0 : index
    %c0_0 = arith.constant 0 : index
    %c0_1 = arith.constant 0 : index
    %0 = vector.load %arg1[%c0, %c0_0, %c0_1] : memref<2x64x256xf32, #tpu.memory_space<vmem>>, vector<2x64x256xf32>
    %cst = arith.constant dense<0.000000e+00> : vector<2x64xf32>
    %1 = vector.multi_reduction <add>, %0, %cst [2] : vector<2x64x256xf32> to vector<2x64xf32>
    %cst_2 = arith.constant 3.906250e-03 : f32
    %2 = vector.broadcast %cst_2 : f32 to vector<2x64xf32>
    %3 = arith.mulf %1, %2 : vector<2x64xf32>
    %cst_3 = arith.constant dense<0xFF800000> : vector<2x64xf32>
    %4 = vector.multi_reduction <maximumf>, %0, %cst_3 [2] : vector<2x64x256xf32> to vector<2x64xf32>
    %c0_4 = arith.constant 0 : index
    %c0_5 = arith.constant 0 : index
    %5 = vector.load %arg2[%c0_4, %c0_5] : memref<4x64xf32, #tpu.memory_space<vmem>>, vector<4x64xf32>
    %c0_6 = arith.constant 0 : index
    %c0_7 = arith.constant 0 : index
    %6 = vector.load %arg3[%c0_6, %c0_7] : memref<64x4xf32, #tpu.memory_space<vmem>>, vector<64x4xf32>
    %cst_8 = arith.constant dense<0.000000e+00> : vector<2x4xf32>
    %7 = tpu.matmul %3, %5, %cst_8 {dimension_numbers = #tpu.dot_dimension_numbers<[1], [1], [0], [0], [0, 0, 1, 0], [], []>} : vector<2x64xf32>, vector<4x64xf32>, vector<2x4xf32> -> vector<2x4xf32>
    %cst_9 = arith.constant 0.000000e+00 : f32
    %8 = vector.broadcast %cst_9 : f32 to vector<2x4xf32>
    %9 = arith.maximumf %7, %8 : vector<2x4xf32>
    %cst_10 = arith.constant dense<0.000000e+00> : vector<2x4xf32>
    %10 = tpu.matmul %4, %5, %cst_10 {dimension_numbers = #tpu.dot_dimension_numbers<[1], [1], [0], [0], [0, 0, 1, 0], [], []>} : vector<2x64xf32>, vector<4x64xf32>, vector<2x4xf32> -> vector<2x4xf32>
    %cst_11 = arith.constant 0.000000e+00 : f32
    %11 = vector.broadcast %cst_11 : f32 to vector<2x4xf32>
    %12 = arith.maximumf %10, %11 : vector<2x4xf32>
    %13 = arith.addf %9, %12 : vector<2x4xf32>
    %cst_12 = arith.constant dense<0.000000e+00> : vector<2x64xf32>
    %14 = tpu.matmul %13, %6, %cst_12 {dimension_numbers = #tpu.dot_dimension_numbers<[1], [1], [0], [0], [0, 0, 1, 0], [], []>} : vector<2x4xf32>, vector<64x4xf32>, vector<2x64xf32> -> vector<2x64xf32>
    %cst_13 = arith.constant 0.000000e+00 : f32
    %15 = vector.broadcast %cst_13 : f32 to vector<2x64xf32>
    %16 = arith.subf %15, %14 : vector<2x64xf32>
    %17 = math.exp %16 : vector<2x64xf32>
    %cst_14 = arith.constant 1.000000e+00 : f32
    %18 = vector.broadcast %cst_14 : f32 to vector<2x64xf32>
    %19 = arith.addf %18, %17 : vector<2x64xf32>
    %cst_15 = arith.constant 1.000000e+00 : f32
    %20 = vector.broadcast %cst_15 : f32 to vector<2x64xf32>
    %21 = arith.divf %20, %19 : vector<2x64xf32>
    %22 = vector.shape_cast %21 : vector<2x64xf32> to vector<1x2x64xf32>
    %c0_16 = arith.constant 0 : index
    %c0_17 = arith.constant 0 : index
    %c0_18 = arith.constant 0 : index
    %23 = vector.load %arg4[%c0_16, %c0_17, %c0_18] : memref<1x2x64xf32, #tpu.memory_space<vmem>>, vector<1x2x64xf32>
    tpu.vector_store %arg4[%c0_16, %c0_17, %c0_18], %22 {strides = array<i32>} : memref<1x2x64xf32, #tpu.memory_space<vmem>>, vector<1x2x64xf32>,
    return
  }
  func.func @transform_0(%arg0: i32) -> (i32, i32, i32) {
    %c0_i32 = arith.constant 0 : i32
    %c0_i32_0 = arith.constant 0 : i32
    %c0_i32_1 = arith.constant 0 : i32
    return %arg0, %c0_i32, %c0_i32_0 : i32, i32, i32
  }
  func.func @transform_1(%arg0: i32) -> (i32, i32) {
    %c0_i32 = arith.constant 0 : i32
    %c0_i32_0 = arith.constant 0 : i32
    %c0_i32_1 = arith.constant 0 : i32
    return %c0_i32, %c0_i32_0 : i32, i32
  }
  func.func @transform_2(%arg0: i32) -> (i32, i32) {
    %c0_i32 = arith.constant 0 : i32
    %c0_i32_0 = arith.constant 0 : i32
    %c0_i32_1 = arith.constant 0 : i32
    return %c0_i32, %c0_i32_0 : i32, i32
  }
  func.func @transform_3(%arg0: i32) -> (i32, i32, i32) {
    %c0_i32 = arith.constant 0 : i32
    %c0_i32_0 = arith.constant 0 : i32
    %c0_i32_1 = arith.constant 0 : i32
    return %arg0, %c0_i32, %c0_i32_0 : i32, i32, i32
  }
}

</mosaic_0001>

<bundles_post_ra>
// kernel: tpu_custom_call.1
= control target key start
LH: loop header
LB: loop body
LE: loop exit
PB: predicated region body
PF: predicated region fallthrough
CT: control target
= control target key end

     0   :  { %8 = vsyncpa [#allocation3], 0  ;;  %s1002_s0 = inlined_call_operand.hbm [shape: f32[2,64,256], index: 0, kind: input, shape index: {}]   ;;  %s1003_s1 = inlined_call_operand.vmem [shape: f32[4,64], index: 1, kind: input, shape index: {}]   ;;  %s1004_s2 = inlined_call_operand.vmem [shape: f32[64,4], index: 2, kind: input, shape index: {}]   ;;  %s1005_s3 = inlined_call_operand.hbm [shape: f32[1,2,64], index: 3, kind: output, shape index: {}]  }
   0x1   :  { %9 = vsyncpa [#allocation4], 0  ;;  %s791_s12 = smov [#allocation2]   ;;  %s743_s16 = scalar_lea.hbm %s1002_s0, 4096 }
   0x2   :  { %s15_s13 = sshll.u32 %s791_s12, 4  ;;  %p744_p0 = scmp.ne.s32.totalorder %s1002_s0, %s743_s16  ;;  %s16_s13 = int_to_ptr.vmem [resolvable:$true] %s15_s13 }
   0x3   :  { %p747_p1 = scmp.lt.u32.totalorder %s743_s16, %s1002_s0 }
   0x5   :  { %p749_p2 = pnand %p747_p1, %p744_p0 }
   0x7   :  { %752 = shalt.err (!%p749_p2)
}
   0x8   :  { %s753_s21 = scalar_lea.vmem %s16_s13, 4096  ;;  %p758_p4 = scmp.lt.s32.totalorder %s16_s13, %s16_s13 }
   0x9   :  { %p754_p3 = scmp.ne.s32.totalorder %s16_s13, %s753_s21  ;;  %p759_p5 = scmp.lt.s32.totalorder %s753_s21, %s753_s21 }
   0xb   :  { %p760_p6 = por %p759_p5, %p758_p4 }
   0xd   :  { %p761_p7 = pnand %p760_p6, %p754_p3 }
   0xf   :  { %764 = shalt.err (!%p761_p7)
}
  0x10   :  { %s792_s22 = smov 256   ;;  %s793_s23 = smov 16  }
  0x11   :  { %21 = dma.hbm_to_vmem [thread:$0]  %s1002_s0, 4096, %s16_s13, [#allocation3], %s792_s22, %s792_s22, %s793_s23  }
  0x12   :  { %787 = dma.done.wait [#allocation3], 4096  }
  0x13   :  { %788 = vsyncadd [#allocation3], 4294963200  ;;  %v830_v0 = vld [vmem:[#allocation2 + $0x80] sm:$0xff]  ;;  %v832_v1 = vld [vmem:[#allocation2 + $0x88] sm:$0xff]  ;;  %v794_v58 = vmov 0.0   ;;  %vm294_vm0 = vcmask 523264  }
  0x14   :  { %v834_v2 = vld [vmem:[#allocation2] sm:$0xff]  ;;  %v85_v3 = vadd.f32 %v832_v1, %v830_v0  ;;  %v838_v4 = vld [vmem:[#allocation2 + $0x8] sm:$0xff]  ;;  %v840_v5 = vld [vmem:[#allocation2 + $0x90] sm:$0xff]  ;;  %v149_v51 = vmax.f32 %v830_v0, %v832_v1  ;;  %687 = vmatprep.subr.mxu1 %v794_v58  ;;  %vm795_vm1 = vmmov 0   ;;  %vm209_vm2 = vcmask 130112  }
  0x15   :  { %v842_v6 = vld [vmem:[#allocation2 + $0x98] sm:$0xff]  ;;  %v61_v7 = vadd.f32 %v838_v4, %v834_v2  ;;  %v31_v8 = vld [vmem:[#allocation2 + $0x10] sm:$0xff]  ;;  %v49_v12 = vld [vmem:[#allocation2 + $0xa0] sm:$0xff]  ;;  %v125_v49 = vmax.f32 %v834_v2, %v838_v4  ;;  %689 = vmatprep.mubr.msk.f32.mxu1 %vm795_vm1, %v794_v58  ;;  %713 = vmatprep.mubr.msk.f32.mxu0 %vm795_vm1, %v794_v58  ;;  %vm216_vm3 = vcmask 195712   ;;  %vm223_vm4 = vcmask 261312  }
  0x16   :  { %v32_v9 = vld [vmem:[#allocation2 + $0x18] sm:$0xff]  ;;  %86 = vadd.xlane.f32.xlu1 %v85_v3  ;;  %v88_v10 = vadd.f32 %v842_v6, %v840_v5  ;;  %v50_v13 = vld [vmem:[#allocation2 + $0xa8] sm:$0xff]  ;;  %v33_v14 = vld [vmem:[#allocation2 + $0x20] sm:$0xff]  ;;  %v152_v50 = vmax.f32 %v840_v5, %v842_v6  ;;  %v198_v6 = vlaneseq  ;;  %vm230_vm5 = vcmask 326912  }
  0x17   :  { %62 = vadd.xlane.f32.xlu0 %v61_v7  ;;  %v64_v11 = vadd.f32 %v32_v9, %v31_v8  ;;  %v34_v15 = vld [vmem:[#allocation2 + $0x28] sm:$0xff]  ;;  %v91_v16 = vadd.f32 %v50_v13, %v49_v12  ;;  %v51_v18 = vld [vmem:[#allocation2 + $0xb0] sm:$0xff]  ;;  %v52_v19 = vld [vmem:[#allocation2 + $0xb8] sm:$0xff]  ;;  %v128_v48 = vmax.f32 %v31_v8, %v32_v9  ;;  %v155_v52 = vmax.f32 %v49_v12, %v50_v13 }
  0x18   :  { %v67_v17 = vadd.f32 %v34_v15, %v33_v14  ;;  %v35_v20 = vld [vmem:[#allocation2 + $0x30] sm:$0xff]  ;;  %v36_v21 = vld [vmem:[#allocation2 + $0x38] sm:$0xff]  ;;  %v94_v22 = vadd.f32 %v52_v19, %v51_v18  ;;  %v53_v24 = vld [vmem:[#allocation2 + $0xc0] sm:$0xff]  ;;  %v131_v53 = vmax.f32 %v33_v14, %v34_v15  ;;  %v158_v54 = vmax.f32 %v51_v18, %v52_v19 }
  0x19   :  { %v70_v23 = vadd.f32 %v36_v21, %v35_v20  ;;  %v54_v25 = vld [vmem:[#allocation2 + $0xc8] sm:$0xff]  ;;  %v37_v26 = vld [vmem:[#allocation2 + $0x40] sm:$0xff]  ;;  %v55_v30 = vld [vmem:[#allocation2 + $0xd0] sm:$0xff]  ;;  %v134_v55 = vmax.f32 %v35_v20, %v36_v21  ;;  %v199_v9 = vand.u32 127, %v198_v6  ;;  %vm237_vm6 = vcmask 392512  }
  0x1a   :  { %89 = vadd.xlane.f32.xlu1 %v88_v10  ;;  %v38_v27 = vld [vmem:[#allocation2 + $0x48] sm:$0xff]  ;;  %v97_v28 = vadd.f32 %v54_v25, %v53_v24  ;;  %v56_v31 = vld [vmem:[#allocation2 + $0xd8] sm:$0xff]  ;;  %v39_v32 = vld [vmem:[#allocation2 + $0x50] sm:$0xff]  ;;  %v161_v56 = vmax.f32 %v53_v24, %v54_v25  ;;  %vm244_vm7 = vcmask 458112   ;;  %vm251_vm8 = vcmask 523712  }
  0x1b   :  { %65 = vadd.xlane.f32.xlu0 %v64_v11  ;;  %v73_v29 = vadd.f32 %v38_v27, %v37_v26  ;;  %v40_v33 = vld [vmem:[#allocation2 + $0x58] sm:$0xff]  ;;  %v100_v34 = vadd.f32 %v56_v31, %v55_v30  ;;  %v57_v36 = vld [vmem:[#allocation2 + $0xe0] sm:$0xff]  ;;  %v58_v37 = vld [vmem:[#allocation2 + $0xe8] sm:$0xff]  ;;  %v137_v57 = vmax.f32 %v37_v26, %v38_v27  ;;  %v164_v60 = vmax.f32 %v55_v30, %v56_v31 }
  0x1c   :  { %v76_v35 = vadd.f32 %v40_v33, %v39_v32  ;;  %v41_v38 = vld [vmem:[#allocation2 + $0x60] sm:$0xff]  ;;  %v42_v39 = vld [vmem:[#allocation2 + $0x68] sm:$0xff]  ;;  %v103_v40 = vadd.f32 %v58_v37, %v57_v36  ;;  %v59_v42 = vld [vmem:[#allocation2 + $0xf0] sm:$0xff]  ;;  %v140_v61 = vmax.f32 %v39_v32, %v40_v33  ;;  %v167_v62 = vmax.f32 %v57_v36, %v58_v37 }
  0x1d   :  { %v79_v41 = vadd.f32 %v42_v39, %v41_v38  ;;  %v60_v43 = vld [vmem:[#allocation2 + $0xf8] sm:$0xff]  ;;  %v43_v44 = vld [vmem:[#allocation2 + $0x70] sm:$0xff]  ;;  %v858_v59 = vld [vmem:[%s1003_s1] sm:$0xf]  ;;  %v143_v63 = vmax.f32 %v41_v38, %v42_v39  ;;  %v201_v11 = vshrl.u32 %v198_v6, 7  ;;  %v204_v13 = vadd.s32 4294967288, %v199_v9 }
  0x1e   :  { %92 = vadd.xlane.f32.xlu1 %v91_v16  ;;  %v44_v45 = vld [vmem:[#allocation2 + $0x78] sm:$0xff]  ;;  %v106_v46 = vadd.f32 %v60_v43, %v59_v42  ;;  %688 = vmatpush3.xpose.msk.msra.mxu1 %vm294_vm0, %v858_v59  ;;  %v170_v0 = vmax.f32 %v59_v42, %v60_v43  ;;  %v211_v14 = vadd.s32 4294967280, %v199_v9  ;;  %v218_v15 = vadd.s32 4294967272, %v199_v9 }
  0x1f   :  { %68 = vadd.xlane.f32.xlu0 %v67_v17  ;;  %v82_v47 = vadd.f32 %v44_v45, %v43_v44  ;;  %692 = vmatprep.subr.mxu1 %v794_v58  ;;  %v146_v1 = vmax.f32 %v43_v44, %v44_v45  ;;  %v225_v16 = vadd.s32 4294967264, %v199_v9  ;;  %v232_v18 = vadd.s32 4294967256, %v199_v9 }
  0x20   :  { %v867_v19 = vsub.s32 %v199_v9, %v201_v11  ;;  %v869_v21 = vsub.s32 %v204_v13, %v201_v11  ;;  %v873_v25 = vsub.s32 %v218_v15, %v201_v11  ;;  %v246_v42 = vadd.s32 4294967240, %v199_v9 }
  0x21   :  { %v875_v26 = vsub.s32 %v225_v16, %v201_v11  ;;  %vm292_vm9 = vcmask 1041409   ;;  %vm540_vm10 = vcmask 31744   ;;  %vm644_vm12 = vcmask 517120  }
  0x22   :  { %95 = vadd.xlane.f32.xlu1 %v94_v22  ;;  %v871_v22 = vsub.s32 %v211_v14, %v201_v11  ;;  %vm959_vm11 = vmpackc.low %vm540_vm10, %vm540_vm10 }
  0x23   :  { %71 = vadd.xlane.f32.xlu0 %v70_v23  ;;  %v239_v23 = vadd.s32 4294967248, %v199_v9 }
  0x25   :  { %v879_v38 = vsub.s32 %v239_v23, %v201_v11 }
  0x26   :  { %98 = vadd.xlane.f32.xlu1 %v97_v28 }
  0x27   :  { %74 = vadd.xlane.f32.xlu0 %v73_v29  ;;  %v877_v29 = vsub.s32 %v232_v18, %v201_v11 }
  0x2a   :  { %101 = vadd.xlane.f32.xlu1 %v100_v34 }
  0x2b   :  { %77 = vadd.xlane.f32.xlu0 %v76_v35 }
  0x2e   :  { %104 = vadd.xlane.f32.xlu1 %v103_v40 }
  0x2f   :  { %80 = vadd.xlane.f32.xlu0 %v79_v41 }
  0x32   :  { %107 = vadd.xlane.f32.xlu1 %v106_v46 }
  0x33   :  { %83 = vadd.xlane.f32.xlu0 %v82_v47 }
  0x36   :  { %129 = vmax.xlane.f32.xlu1 %v128_v48 }
  0x37   :  { %126 = vmax.xlane.f32.xlu0 %v125_v49 }
  0x3a   :  { %153 = vmax.xlane.f32.xlu1 %v152_v50 }
  0x3b   :  { %150 = vmax.xlane.f32.xlu0 %v149_v51 }
  0x3e   :  { %156 = vmax.xlane.f32.xlu1 %v155_v52 }
  0x3f   :  { %132 = vmax.xlane.f32.xlu0 %v131_v53 }
  0x42   :  { %159 = vmax.xlane.f32.xlu1 %v158_v54 }
  0x43   :  { %135 = vmax.xlane.f32.xlu0 %v134_v55 }
  0x46   :  { %162 = vmax.xlane.f32.xlu1 %v161_v56 }
  0x47   :  { %138 = vmax.xlane.f32.xlu0 %v137_v57 }
  0x4a   :  { %165 = vmax.xlane.f32.xlu1 %v164_v60 }
  0x4b   :  { %141 = vmax.xlane.f32.xlu0 %v140_v61  ;;  %v893_v61 = vsub.s32 %v246_v42, %v201_v11 }
  0x4e   :  { %168 = vmax.xlane.f32.xlu1 %v167_v62 }
  0x4f   :  { %144 = vmax.xlane.f32.xlu0 %v143_v63 }
  0x52   :  { %171 = vmax.xlane.f32.xlu1 %v170_v0 }
  0x53   :  { %147 = vmax.xlane.f32.xlu0 %v146_v1 }
  0xa3   :  { %v87_v2 = vpop.xlane.xlu1 %86 }
  0xa4   :  { %v63_v3 = vpop.xlane.xlu0 %62  ;;  %v117_v31 = vmul.f32 0.00390625, %v87_v2 }
  0xa5   :  { %v109_v35 = vmul.f32 0.00390625, %v63_v3 }
  0xa6   :  { %v256_v47 = vrot.slane %v117_v31, %v867_v19 }
  0xa7   :  { %v90_v4 = vpop.xlane.xlu1 %89  ;;  %v203_v52 = vrot.slane %v109_v35, %v867_v19 }
  0xa8   :  { %v66_v5 = vpop.xlane.xlu0 %65  ;;  %v118_v24 = vmul.f32 0.00390625, %v90_v4 }
  0xa9   :  { %v110_v27 = vmul.f32 0.00390625, %v66_v5 }
  0xaa   :  { %v260_v39 = vrot.slane %v118_v24, %v869_v21 }
  0xab   :  { %v93_v7 = vpop.xlane.xlu1 %92  ;;  %v208_v43 = vrot.slane %v110_v27, %v869_v21 }
  0xac   :  { %v69_v8 = vpop.xlane.xlu0 %68  ;;  %v119_v28 = vmul.f32 0.00390625, %v93_v7  ;;  %v261_v56 = vsel %vm209_vm2, %v260_v39, %v256_v47 }
  0xad   :  { %v111_v32 = vmul.f32 0.00390625, %v69_v8  ;;  %v210_v62 = vsel %vm209_vm2, %v208_v43, %v203_v52 }
  0xae   :  { %v265_v44 = vrot.slane %v119_v28, %v871_v22 }
  0xaf   :  { %v96_v10 = vpop.xlane.xlu1 %95  ;;  %v215_v48 = vrot.slane %v111_v32, %v871_v22 }
  0xb0   :  { %v72_v12 = vpop.xlane.xlu0 %71  ;;  %v120_v33 = vmul.f32 0.00390625, %v96_v10  ;;  %v266_v63 = vsel %vm216_vm3, %v265_v44, %v261_v56 }
  0xb1   :  { %v112_v36 = vmul.f32 0.00390625, %v72_v12  ;;  %v217_v3 = vsel %vm216_vm3, %v215_v48, %v210_v62 }
  0xb2   :  { %v270_v49 = vrot.slane %v120_v33, %v873_v25 }
  0xb3   :  { %v99_v17 = vpop.xlane.xlu1 %98  ;;  %v222_v53 = vrot.slane %v112_v36, %v873_v25 }
  0xb4   :  { %v75_v20 = vpop.xlane.xlu0 %74  ;;  %v121_v37 = vmul.f32 0.00390625, %v99_v17  ;;  %v271_v4 = vsel %vm223_vm4, %v270_v49, %v266_v63 }
  0xb5   :  { %v113_v40 = vmul.f32 0.00390625, %v75_v20  ;;  %v224_v8 = vsel %vm223_vm4, %v222_v53, %v217_v3 }
  0xb6   :  { %v275_v54 = vrot.slane %v121_v37, %v875_v26 }
  0xb7   :  { %v102_v30 = vpop.xlane.xlu1 %101  ;;  %v229_v57 = vrot.slane %v113_v40, %v875_v26 }
  0xb8   :  { %v78_v34 = vpop.xlane.xlu0 %77  ;;  %v122_v41 = vmul.f32 0.00390625, %v102_v30  ;;  %v276_v9 = vsel %vm230_vm5, %v275_v54, %v271_v4 }
  0xb9   :  { %v114_v45 = vmul.f32 0.00390625, %v78_v34  ;;  %v231_v11 = vsel %vm230_vm5, %v229_v57, %v224_v8 }
  0xba   :  { %v280_v60 = vrot.slane %v122_v41, %v877_v29 }
  0xbb   :  { %v105_v46 = vpop.xlane.xlu1 %104  ;;  %v236_v0 = vrot.slane %v114_v45, %v877_v29 }
  0xbc   :  { %v123_v50 = vmul.f32 0.00390625, %v105_v46  ;;  %v81_v51 = vpop.xlane.xlu0 %80  ;;  %v281_v12 = vsel %vm237_vm6, %v280_v60, %v276_v9  ;;  %v176_v9 = vld [vmem:[%s1004_s2 + $0x10] sm:$0xff] }
  0xbd   :  { %v115_v55 = vmul.f32 0.00390625, %v81_v51  ;;  %v238_v14 = vsel %vm237_vm6, %v236_v0, %v231_v11 }
  0xbe   :  { %v285_v1 = vrot.slane %v123_v50, %v879_v38 }
  0xbf   :  { %v108_v2 = vpop.xlane.xlu1 %107  ;;  %v243_v5 = vrot.slane %v115_v55, %v879_v38 }
  0xc0   :  { %v124_v6 = vmul.f32 0.00390625, %v108_v2  ;;  %v84_v7 = vpop.xlane.xlu0 %83  ;;  %v286_v15 = vsel %vm244_vm7, %v285_v1, %v281_v12  ;;  %v178_v12 = vld [vmem:[%s1004_s2 + $0x20] sm:$0xff] }
  0xc1   :  { %v116_v10 = vmul.f32 0.00390625, %v84_v7  ;;  %v245_v18 = vsel %vm244_vm7, %v243_v5, %v238_v14  ;;  %v174_v5 = vld [vmem:[%s1004_s2] sm:$0xff] }
  0xc2   :  { %v290_v13 = vrot.slane %v124_v6, %v893_v61  ;;  %v175_v6 = vld [vmem:[%s1004_s2 + $0x8] sm:$0xff] }
  0xc3   :  { %v250_v16 = vrot.slane %v116_v10, %v893_v61  ;;  %v130_v17 = vpop.xlane.xlu1 %129  ;;  %v717_v7 = vpack.c.bf16 %v175_v6, %v174_v5  ;;  %v177_v10 = vld [vmem:[%s1004_s2 + $0x18] sm:$0xff] }
  0xc4   :  { %v127_v20 = vpop.xlane.xlu0 %126  ;;  %v291_v23 = vsel %vm251_vm8, %v290_v13, %v286_v15  ;;  %v394_v42 = vrot.slane %v130_v17, %v869_v21  ;;  %v721_v11 = vpack.c.bf16 %v177_v10, %v176_v9  ;;  %v179_v13 = vld [vmem:[%s1004_s2 + $0x28] sm:$0xff]  ;;  %v180_v15 = vld [vmem:[%s1004_s2 + $0x30] sm:$0xff] }
  0xc5   :  { %v252_v24 = vsel %vm251_vm8, %v250_v16, %v245_v18  ;;  %v390_v43 = vrot.slane %v127_v20, %v867_v19  ;;  %v725_v14 = vpack.c.bf16 %v179_v13, %v178_v12  ;;  %v181_v16 = vld [vmem:[%s1004_s2 + $0x38] sm:$0xff]  ;;  %s797_s2 = smov [#allocation5]  }
  0xc6   :  { %v293_v27 = vsel %vm292_vm9, %v291_v23, %v252_v24  ;;  %v729_v17 = vpack.c.bf16 %v181_v16, %v180_v15  ;;  %s652_s15 = sshll.u32 %s797_s2, 4  ;;  %s653_s15 = int_to_ptr.vmem [resolvable:$true] %s652_s15 }
  0xc7   :  { %690 = vmatmul.mubr.msk.f32.vlgmr.msra.gmra.mrb[0].mxu1 %vm294_vm0, %v293_v27  ;;  %v154_v28 = vpop.xlane.xlu1 %153  ;;  %s765_s16 = scalar_lea.vmem %s653_s15, 32  ;;  %p770_p9 = scmp.lt.s32.totalorder %s653_s15, %s653_s15 }
  0xc8   :  { %v151_v30 = vpop.xlane.xlu0 %150  ;;  %693 = vmatpush3.xpose.msk.msra.mxu1 %vm294_vm0, %v858_v59  ;;  %694 = vmatprep.mubr.msk.f32.mxu1 %vm795_vm1, %v794_v58  ;;  %v433_v39 = vrot.slane %v154_v28, %v869_v21  ;;  %p766_p8 = scmp.ne.s32.totalorder %s653_s15, %s765_s16  ;;  %p771_p10 = scmp.lt.s32.totalorder %s765_s16, %s765_s16 }
  0xc9   :  { %v429_v40 = vrot.slane %v151_v30, %v867_v19  ;;  %v395_v19 = vsel %vm209_vm2, %v394_v42, %v390_v43 }
  0xca   :  { %p772_p11 = por %p771_p10, %p770_p9 }
  0xcb   :  { %v157_v31 = vpop.xlane.xlu1 %156  ;;  %v434_v48 = vsel %vm209_vm2, %v433_v39, %v429_v40 }
  0xcc   :  { %v133_v32 = vpop.xlane.xlu0 %132  ;;  %v438_v59 = vrot.slane %v157_v31, %v871_v22  ;;  %p773_p12 = pnand %p772_p11, %p766_p8 }
  0xcd   :  { %v399_v58 = vrot.slane %v133_v32, %v871_v22 }
  0xce   :  { %v439_v51 = vsel %vm216_vm3, %v438_v59, %v434_v48 }
  0xcf   :  { %v160_v33 = vpop.xlane.xlu1 %159 }
  0xd0   :  { %v136_v34 = vpop.xlane.xlu0 %135  ;;  %v443_v44 = vrot.slane %v160_v33, %v873_v25 }
  0xd1   :  { %v404_v45 = vrot.slane %v136_v34, %v873_v25  ;;  %v400_v25 = vsel %vm216_vm3, %v399_v58, %v395_v19 }
  0xd2   :  { %v444_v53 = vsel %vm223_vm4, %v443_v44, %v439_v51 }
  0xd3   :  { %v163_v35 = vpop.xlane.xlu1 %162  ;;  %v405_v55 = vsel %vm223_vm4, %v404_v45, %v400_v25 }
  0xd4   :  { %v139_v36 = vpop.xlane.xlu0 %138  ;;  %v448_v46 = vrot.slane %v163_v35, %v875_v26 }
  0xd5   :  { %v409_v49 = vrot.slane %v139_v36, %v875_v26 }
  0xd6   :  { %v449_v26 = vsel %vm230_vm5, %v448_v46, %v444_v53 }
  0xd7   :  { %v166_v37 = vpop.xlane.xlu1 %165  ;;  %v410_v57 = vsel %vm230_vm5, %v409_v49, %v405_v55 }
  0xd8   :  { %v142_v41 = vpop.xlane.xlu0 %141  ;;  %v453_v50 = vrot.slane %v166_v37, %v877_v29 }
  0xd9   :  { %v414_v22 = vrot.slane %v142_v41, %v877_v29 }
  0xda   :  { %v454_v60 = vsel %vm237_vm6, %v453_v50, %v449_v26 }
  0xdb   :  { %v169_v47 = vpop.xlane.xlu1 %168  ;;  %v415_v63 = vsel %vm237_vm6, %v414_v22, %v410_v57 }
  0xdc   :  { %v145_v21 = vpop.xlane.xlu0 %144  ;;  %v458_v52 = vrot.slane %v169_v47, %v879_v38 }
  0xdd   :  { %v419_v54 = vrot.slane %v145_v21, %v879_v38 }
  0xde   :  { %v459_v0 = vsel %vm244_vm7, %v458_v52, %v454_v60 }
  0xdf   :  { %v172_v56 = vpop.xlane.xlu1 %171  ;;  %v420_v38 = vsel %vm244_vm7, %v419_v54, %v415_v63 }
  0xe0   :  { %v463_v62 = vrot.slane %v172_v56, %v893_v61  ;;  %v148_v29 = vpop.xlane.xlu0 %147 }
  0xe1   :  { %v424_v1 = vrot.slane %v148_v29, %v893_v61  ;;  %v796_v61 = vmov 0.0|0.0  }
  0xe2   :  { %v464_v2 = vsel %vm251_vm8, %v463_v62, %v459_v0  ;;  %716 = vmatprep.subr.bf16.mxu0 %v796_v61 }
  0xe3   :  { %v425_v3 = vsel %vm251_vm8, %v424_v1, %v420_v38  ;;  %719 = vmatpush3.bf16.xpose.msk.msra.mxu0 %vm959_vm11, %v717_v7 }
  0xe4   :  { %v465_v4 = vsel %vm292_vm9, %v464_v2, %v425_v3  ;;  %720 = vmatprep.subr.bf16.mxu0 %v796_v61 }
  0xe5   :  { %695 = vmatmul.mubr.msk.f32.vlgmr.msra.gmra.mrb[2].mxu1 %vm294_vm0, %v465_v4 }
  0xeb   :  { %723 = vmatpush3.bf16.xpose.msk.msra.mxu0 %vm959_vm11, %v721_v11 }
  0xec   :  { %724 = vmatprep.subr.bf16.mxu0 %v796_v61 }
  0xf3   :  { %727 = vmatpush3.bf16.xpose.msk.msra.mxu0 %vm959_vm11, %v725_v14 }
  0xf4   :  { %728 = vmatprep.subr.bf16.mxu0 %v796_v61 }
  0xfb   :  { %731 = vmatpush3.bf16.xpose.msk.msra.mxu0 %vm959_vm11, %v729_v17 }
 0x19a   :  { %v366_v18 = vpop.f32.mrb[0].mxu1 }
 0x19b   :  { %v691_v20 = vpop.f32.mrb[1].mxu1  ;;  %v370_v24 = vmax.f32 %v366_v18, 0.0 }
 0x1b8   :  { %v534_v23 = vpop.f32.mrb[2].mxu1 }
 0x1b9   :  { %v538_v27 = vmax.f32 %v534_v23, 0.0  ;;  %v696_v28 = vpop.f32.mrb[3].mxu1 }
 0x1bb   :  { %v539_v30 = vadd.f32 %v538_v27, %v370_v24 }
 0x1bd   :  { %714 = vmatmul.mubr.msk.f32.vlgmr.msra.gmra.mrb[0].mxu0 %vm540_vm10, %v539_v30 }
 0x290   :  { %v634_v31 = vpop.f32.mrb[0].mxu0 }
 0x291   :  { %v638_v32 = vsub.f32 0.0, %v634_v31  ;;  %v715_v33 = vpop.f32.mrb[1].mxu0 }
 0x293   :  { %v639_v34 = vmul.f32 1.442695, %v638_v32 }
 0x295   :  { %739 = vpow2.f32 %v639_v34 }
 0x29f   :  { %v740_v35 = vpop.eup %739 }
 0x2a0   :  { %v641_v36 = vadd.f32 1.0, %v740_v35 }
 0x2a2   :  { %741 = vrcp.f32 %v641_v36 }
 0x2ac   :  { %v742_v37 = vpop.eup %741 }
 0x2ad   :  { %645 = vst.msk [vmem:[#allocation5] sm:$0x3] %vm644_vm12, %v742_v37 }
 0x2ae   :  { %776 = shalt.err (!%p773_p12)
}
 0x2af   :  { %s777_s19 = scalar_lea.hbm %s1005_s3, 32 }
 0x2b0   :  { %p778_p13 = scmp.ne.s32.totalorder %s1005_s3, %s777_s19  ;;  %p781_p0 = scmp.lt.u32.totalorder %s777_s19, %s1005_s3 }
 0x2b2   :  { %p783_p1 = pnand %p781_p0, %p778_p13 }
 0x2b4   :  { %786 = shalt.err (!%p783_p1)
}
 0x2b5   :  { %655 = dma.vmem_to_hbm [thread:$0]  %s653_s15, 32, %s1005_s3, [#allocation4]  }
 0x2b6   :  { %789 = dma.done.wait [#allocation4], 32  }
 0x2b7   :  { %790 = vsyncadd [#allocation4], 4294967264 }
 0x2b8   :  { %659 = vsyncpa [#allocation3], 1 }
 0x2b9   :  { %660 = vsyncpa [#allocation4], 1 }

</bundles_post_ra>
